<compile_context>
chip_gen: v5e
topology: v5e:2x2
jax: 0.10.0
libtpu: 0.0.40
codegen_flags: <defaults>
</compile_context>

<pallas_src>
import functools

import jax
import jax.numpy as jnp
from jax import lax
from jax.experimental import pallas as pl
from jax.experimental.pallas import tpu as pltpu


# ----------------------------------------------------------------------------
# Path A: fully VMEM-resident fused kernel (small M*N, single invocation).
# ----------------------------------------------------------------------------
def _linear_bn_fused_kernel(x_ref, w_ref, gamma_ref, beta_ref, o_ref, *, eps):
    """y = BatchNorm1d(x @ W^T); everything resident in VMEM.

    x_ref     : (M, K)
    w_ref     : (N, K)  PyTorch nn.Linear weight layout (no HBM transpose)
    gamma_ref : (1, N)
    beta_ref  : (1, N)
    o_ref     : (M, N)
    """
    x = x_ref[...]
    w = w_ref[...]
    # NT matmul on the MXU (contract K with K), f32 accumulation.
    y = lax.dot_general(x, w, (((1,), (1,)), ((), ())),
                        preferred_element_type=jnp.float32)           # (M, N)

    inv_m = 1.0 / y.shape[0]
    mean = jnp.sum(y, axis=0, keepdims=True) * inv_m                   # (1, N)
    centered = y - mean
    var = jnp.sum(centered * centered, axis=0, keepdims=True) * inv_m  # biased
    scale = gamma_ref[...].astype(jnp.float32) * lax.rsqrt(var + eps)  # EUP
    o_ref[...] = (centered * scale
                  + beta_ref[...].astype(jnp.float32)).astype(o_ref.dtype)


def _fused_forward(x2, weight, g2, b2, eps):
    M, _ = x2.shape
    N = weight.shape[0]
    return pl.pallas_call(
        functools.partial(_linear_bn_fused_kernel, eps=eps),
        out_shape=jax.ShapeDtypeStruct((M, N), x2.dtype),
        in_specs=[pl.BlockSpec(memory_space=pltpu.MemorySpace.VMEM)] * 4,
        out_specs=pl.BlockSpec(memory_space=pltpu.MemorySpace.VMEM),
    )(x2, weight, g2, b2)


# ----------------------------------------------------------------------------
# Path B: M-tiled two-pass path for production M.
# ----------------------------------------------------------------------------
def _linear_bn_pass1_kernel(x_ref, w_ref, y_ref, sum_ref, ssq_ref):
    """Per-tile matmul + global column sum / sum-of-squares accumulation.

    x_ref : (tm, K)     tile of flattened input
    w_ref : (N, K)      resident weight
    y_ref : (tm, N)     un-normalized f32 linear output tile
    sum_ref, ssq_ref : (1, N) resident accumulators (same block every step)
    """
    i = pl.program_id(0)

    @pl.when(i == 0)
    def _():
        sum_ref[...] = jnp.zeros_like(sum_ref)
        ssq_ref[...] = jnp.zeros_like(ssq_ref)

    y = lax.dot_general(x_ref[...], w_ref[...], (((1,), (1,)), ((), ())),
                        preferred_element_type=jnp.float32)          # (tm, N)
    y_ref[...] = y

    # Column reductions pushed onto the MXU (frees VPU/XLU slots): ones @ y.
    ones_row = jnp.ones((1, y.shape[0]), jnp.float32)
    sum_ref[...] += jnp.dot(ones_row, y, preferred_element_type=jnp.float32)
    ssq_ref[...] += jnp.dot(ones_row, y * y, preferred_element_type=jnp.float32)


def _linear_bn_pass2_kernel(sum_ref, ssq_ref, gamma_ref, beta_ref, y_ref, o_ref,
                            *, inv_m, eps):
    """Normalize stored y with full-batch stats: one mul + one add per element."""
    mean = sum_ref[...] * inv_m
    var = jnp.maximum(ssq_ref[...] * inv_m - mean * mean, 0.0)  # guard cancellation
    scale = gamma_ref[...].astype(jnp.float32) * lax.rsqrt(var + eps)
    shift = beta_ref[...].astype(jnp.float32) - mean * scale
    o_ref[...] = (y_ref[...] * scale + shift).astype(o_ref.dtype)


def _tiled_forward(x2, weight, g2, b2, eps, block_m):
    M, K = x2.shape
    N = weight.shape[0]
    dtype = x2.dtype
    itemsize = jnp.dtype(dtype).itemsize

    # Zero-pad M to a tile multiple.  Zero rows contribute exactly 0 to both
    # the column sum and sum-of-squares, so the batch statistics stay correct
    # as long as inv_m uses the true M; padded rows are sliced off at the end.
    m_pad = pl.cdiv(M, block_m) * block_m
    if m_pad != M:
        x2 = jnp.pad(x2, ((0, m_pad - M), (0, 0)))
    n_tiles = m_pad // block_m

    # Per-step VMEM footprint (x tile + resident weight + f32 y tile + stat
    # rows); x4 covers double-buffering. Set the scoped-VMEM limit explicitly
    # so the same tiling fits v7x's smaller VMEM.
    step_bytes = (block_m * K * itemsize + N * K * itemsize
                  + block_m * N * 4 + 4 * N * 4)
    vmem_limit = int(min(max(4 * step_bytes, 16 * 2**20), 48 * 2**20))

    # Pass 1: matmul + stats. The accumulators couple all tiles -> "arbitrary".
    y_f32, col_sum, col_ssq = pl.pallas_call(
        _linear_bn_pass1_kernel,
        out_shape=(jax.ShapeDtypeStruct((m_pad, N), jnp.float32),
                   jax.ShapeDtypeStruct((1, N), jnp.float32),
                   jax.ShapeDtypeStruct((1, N), jnp.float32)),
        grid=(n_tiles,),
        in_specs=[pl.BlockSpec((block_m, K), lambda i: (i, 0)),
                  pl.BlockSpec((N, K), lambda i: (0, 0))],
        out_specs=(pl.BlockSpec((block_m, N), lambda i: (i, 0)),
                   pl.BlockSpec((1, N), lambda i: (0, 0)),
                   pl.BlockSpec((1, N), lambda i: (0, 0))),
        compiler_params=pltpu.CompilerParams(
            dimension_semantics=("arbitrary",),
            vmem_limit_bytes=vmem_limit),
    )(x2, weight)

    # Pass 2: normalization of the stored y; rows independent -> "parallel".
    out = pl.pallas_call(
        functools.partial(_linear_bn_pass2_kernel, inv_m=1.0 / M, eps=eps),
        out_shape=jax.ShapeDtypeStruct((m_pad, N), dtype),
        grid=(n_tiles,),
        in_specs=[pl.BlockSpec((1, N), lambda i: (0, 0)),
                  pl.BlockSpec((1, N), lambda i: (0, 0)),
                  pl.BlockSpec((1, N), lambda i: (0, 0)),
                  pl.BlockSpec((1, N), lambda i: (0, 0)),
                  pl.BlockSpec((block_m, N), lambda i: (i, 0))],
        out_specs=pl.BlockSpec((block_m, N), lambda i: (i, 0)),
        compiler_params=pltpu.CompilerParams(
            dimension_semantics=("parallel",),
            vmem_limit_bytes=vmem_limit),
    )(col_sum, col_ssq, g2, b2, y_f32)

    return out[:M] if m_pad != M else out


# ----------------------------------------------------------------------------
# Public wrapper: equivalent of LinearBn(dim_in, dim_out).forward(x)
# (use_bn=True, training mode).
# ----------------------------------------------------------------------------
def linear_bn_forward(x, weight, gamma, beta, *, eps=1e-5, block_m=512,
                      fused_bytes_budget=8 * 2**20, force_tiled=False):
    """x: (..., K); weight: (N, K) [nn.Linear, bias=False]; gamma/beta: (N,)."""
    *lead, K = x.shape
    N = weight.shape[0]
    x2 = x.reshape(-1, K)
    M = x2.shape[0]

    # BN affine params as (1, N) lane vectors (free metadata reshape; in
    # production this — and any bf16 cast of x / weight for the MXU — belongs
    # in parameter setup, not the per-call path).
    g2 = gamma.reshape(1, N)
    b2 = beta.reshape(1, N)

    itemsize = jnp.dtype(x.dtype).itemsize
    fused_bytes = (M * K * itemsize + N * K * itemsize
                   + 2 * M * N * 4 + 2 * N * 4)
    if not force_tiled and fused_bytes <= fused_bytes_budget:
        out = _fused_forward(x2, weight, g2, b2, eps)
    else:
        out = _tiled_forward(x2, weight, g2, b2, eps, block_m)
    return out.reshape(*lead, N)


if __name__ == "__main__":
    key = jax.random.PRNGKey(0)

    def reference(x, weight, gamma, beta, eps=1e-5):
        s = x.shape
        y = x.reshape(-1, s[-1]) @ weight.T
        mean = y.mean(axis=0, keepdims=True)
        var = ((y - mean) ** 2).mean(axis=0, keepdims=True)   # biased variance
        y = (y - mean) / jnp.sqrt(var + eps) * gamma + beta
        return y.reshape(*s[:-1], weight.shape[0])

    # --- small shape: fully VMEM-resident fused path -------------------------
    BATCH, SEQ, DIM_IN, DIM_OUT = 2, 8, 16, 128
    k0, k1, k2, k3, key = jax.random.split(key, 5)
    x = jax.random.normal(k0, (BATCH, SEQ, DIM_IN), dtype=jnp.float32)
    bound = 1.0 / (DIM_IN ** 0.5)
    weight = jax.random.uniform(k1, (DIM_OUT, DIM_IN), minval=-bound,
                                maxval=bound, dtype=jnp.float32)
    gamma = jax.random.uniform(k2, (DIM_OUT,), minval=0.5, maxval=1.5,
                               dtype=jnp.float32)
    beta = jax.random.uniform(k3, (DIM_OUT,), minval=-0.5, maxval=0.5,
                              dtype=jnp.float32)

    out = linear_bn_forward(x, weight, gamma, beta)
    jax.block_until_ready(out)
    ref = reference(x, weight, gamma, beta)
    assert out.shape == (BATCH, SEQ, DIM_OUT)
    assert jnp.allclose(out, ref, atol=1e-4, rtol=1e-4)

    # --- larger shape: M-tiled two-pass path (exercises padding + accumulators)
    M2, DIM_IN2, DIM_OUT2 = 600, 32, 256      # M2 not a multiple of block_m
    k0, k1, k2, k3, key = jax.random.split(key, 5)
    x_big = jax.random.normal(k0, (M2, DIM_IN2), dtype=jnp.float32)
    bound = 1.0 / (DIM_IN2 ** 0.5)
    w_big = jax.random.uniform(k1, (DIM_OUT2, DIM_IN2), minval=-bound,
                               maxval=bound, dtype=jnp.float32)
    g_big = jax.random.uniform(k2, (DIM_OUT2,), minval=0.5, maxval=1.5,
                               dtype=jnp.float32)
    b_big = jax.random.uniform(k3, (DIM_OUT2,), minval=-0.5, maxval=0.5,
                               dtype=jnp.float32)

    out_big = linear_bn_forward(x_big, w_big, g_big, b_big,
                                block_m=256, force_tiled=True)
    jax.block_until_ready(out_big)
    ref_big = reference(x_big, w_big, g_big, b_big)
    assert out_big.shape == (M2, DIM_OUT2)
    assert jnp.allclose(out_big, ref_big, atol=5e-4, rtol=5e-4)

    print("KERNEL_OK")
</pallas_src>

<mosaic_0001>
module attributes {stable_mosaic.version = 11 : i64} {
  func.func @_linear_bn_fused_kernel(%arg0: memref<16x16xf32, #tpu.memory_space<vmem>>, %arg1: memref<128x16xf32, #tpu.memory_space<vmem>>, %arg2: memref<1x128xf32, #tpu.memory_space<vmem>>, %arg3: memref<1x128xf32, #tpu.memory_space<vmem>>, %arg4: memref<16x128xf32, #tpu.memory_space<vmem>>) attributes {dimension_semantics = [], scalar_prefetch = 0 : i64, scratch_operands = 0 : i64, tpu.core_type = #tpu.core_type<tc>} {
    %c0 = arith.constant 0 : index
    %c0_0 = arith.constant 0 : index
    %0 = vector.load %arg0[%c0, %c0_0] : memref<16x16xf32, #tpu.memory_space<vmem>>, vector<16x16xf32>
    %c0_1 = arith.constant 0 : index
    %c0_2 = arith.constant 0 : index
    %1 = vector.load %arg1[%c0_1, %c0_2] : memref<128x16xf32, #tpu.memory_space<vmem>>, vector<128x16xf32>
    %cst = arith.constant dense<0.000000e+00> : vector<16x128xf32>
    %2 = tpu.matmul %0, %1, %cst {dimension_numbers = #tpu.dot_dimension_numbers<[1], [1], [0], [0], [0, 0, 1, 0], [], []>} : vector<16x16xf32>, vector<128x16xf32>, vector<16x128xf32> -> vector<16x128xf32>
    %cst_3 = arith.constant dense<0.000000e+00> : vector<128xf32>
    %3 = vector.multi_reduction <add>, %2, %cst_3 [0] : vector<16x128xf32> to vector<128xf32>
    %4 = vector.shape_cast %3 : vector<128xf32> to vector<1x128xf32>
    %cst_4 = arith.constant 6.250000e-02 : f32
    %5 = vector.broadcast %cst_4 : f32 to vector<1x128xf32>
    %6 = arith.mulf %4, %5 : vector<1x128xf32>
    %7 = vector.broadcast %6 : vector<1x128xf32> to vector<16x128xf32>
    %8 = arith.subf %2, %7 : vector<16x128xf32>
    %9 = arith.mulf %8, %8 : vector<16x128xf32>
    %cst_5 = arith.constant dense<0.000000e+00> : vector<128xf32>
    %10 = vector.multi_reduction <add>, %9, %cst_5 [0] : vector<16x128xf32> to vector<128xf32>
    %11 = vector.shape_cast %10 : vector<128xf32> to vector<1x128xf32>
    %cst_6 = arith.constant 6.250000e-02 : f32
    %12 = vector.broadcast %cst_6 : f32 to vector<1x128xf32>
    %13 = arith.mulf %11, %12 : vector<1x128xf32>
    %c0_7 = arith.constant 0 : index
    %c0_8 = arith.constant 0 : index
    %14 = vector.load %arg2[%c0_7, %c0_8] : memref<1x128xf32, #tpu.memory_space<vmem>>, vector<1x128xf32>
    %cst_9 = arith.constant 9.99999974E-6 : f32
    %15 = vector.broadcast %cst_9 : f32 to vector<1x128xf32>
    %16 = arith.addf %13, %15 : vector<1x128xf32>
    %17 = math.rsqrt %16 : vector<1x128xf32>
    %18 = arith.mulf %14, %17 : vector<1x128xf32>
    %19 = vector.broadcast %18 : vector<1x128xf32> to vector<16x128xf32>
    %20 = arith.mulf %8, %19 : vector<16x128xf32>
    %c0_10 = arith.constant 0 : index
    %c0_11 = arith.constant 0 : index
    %21 = vector.load %arg3[%c0_10, %c0_11] : memref<1x128xf32, #tpu.memory_space<vmem>>, vector<1x128xf32>
    %22 = vector.broadcast %21 : vector<1x128xf32> to vector<16x128xf32>
    %23 = arith.addf %20, %22 : vector<16x128xf32>
    %c0_12 = arith.constant 0 : index
    %c0_13 = arith.constant 0 : index
    %24 = vector.load %arg4[%c0_12, %c0_13] : memref<16x128xf32, #tpu.memory_space<vmem>>, vector<16x128xf32>
    tpu.vector_store %arg4[%c0_12, %c0_13], %23 {strides = array<i32>} : memref<16x128xf32, #tpu.memory_space<vmem>>, vector<16x128xf32>,
    return
  }
}

</mosaic_0001>

<bundles_post_ra>
// kernel: tpu_custom_call.1
= control target key start
LH: loop header
LB: loop body
LE: loop exit
PB: predicated region body
PF: predicated region fallthrough
CT: control target
= control target key end

     0   :  { %vm36_vm0 = vcmask 130048   ;;  %s369_s0 = inlined_call_operand.vmem [shape: f32[16,16], index: 0, kind: input, shape index: {}]   ;;  %s370_s1 = inlined_call_operand.vmem [shape: f32[128,16], index: 1, kind: input, shape index: {}]   ;;  %s371_s2 = inlined_call_operand.vmem [shape: f32[1,128], index: 2, kind: input, shape index: {}]   ;;  %s372_s3 = inlined_call_operand.vmem [shape: f32[1,128], index: 3, kind: input, shape index: {}]   ;;  %s373_s4 = inlined_call_operand.hbm [shape: f32[16,128], index: 4, kind: output, shape index: {}]  }
   0x1   :  { %v35_v0 = vld [vmem:[%s370_s1 + $0x78] sm:$0xff]  ;;  %v34_v1 = vld [vmem:[%s370_s1 + $0x70] sm:$0xff] }
   0x2   :  { %178 = vmatpush.xpose.msk.msra.mxu0 %vm36_vm0, %v35_v0  ;;  %196 = vmatpush.xpose.msk.msra.mxu1 %vm36_vm0, %v35_v0 }
   0x3   :  { %9 = vsyncpa [#allocation3], 0  ;;  %v33_v2 = vld [vmem:[%s370_s1 + $0x68] sm:$0xff]  ;;  %v32_v3 = vld [vmem:[%s370_s1 + $0x60] sm:$0xff]  ;;  %s244_s27 = smov [#allocation2]   ;;  %s166_s5 = sshll.u32 %s373_s4, 4  ;;  %s167_s5 = int_to_ptr.hbm [resolvable:$true] %s166_s5 }
   0x4   :  { %v31_v4 = vld [vmem:[%s370_s1 + $0x58] sm:$0xff]  ;;  %v30_v5 = vld [vmem:[%s370_s1 + $0x50] sm:$0xff]  ;;  %v29_v6 = vld [vmem:[%s370_s1 + $0x48] sm:$0xff]  ;;  %s164_s28 = sshll.u32 %s244_s27, 4  ;;  %s246_s6 = smov 8   ;;  %s165_s28 = int_to_ptr.vmem [resolvable:$true] %s164_s28 }
   0x5   :  { %v28_v7 = vld [vmem:[%s370_s1 + $0x40] sm:$0xff]  ;;  %v27_v8 = vld [vmem:[%s370_s1 + $0x38] sm:$0xff]  ;;  %v26_v9 = vld [vmem:[%s370_s1 + $0x30] sm:$0xff] }
   0x6   :  { %179 = vmatpush.xpose.msk.msra.mxu0 %vm36_vm0, %v34_v1  ;;  %197 = vmatpush.xpose.msk.msra.mxu1 %vm36_vm0, %v34_v1  ;;  %v25_v10 = vld [vmem:[%s370_s1 + $0x28] sm:$0xff]  ;;  %v24_v11 = vld [vmem:[%s370_s1 + $0x20] sm:$0xff]  ;;  %v23_v12 = vld [vmem:[%s370_s1 + $0x18] sm:$0xff] }
   0x7   :  { %v22_v13 = vld [vmem:[%s370_s1 + $0x10] sm:$0xff]  ;;  %v21_v14 = vld [vmem:[%s370_s1 + $0x8] sm:$0xff]  ;;  %v20_v15 = vld [vmem:[%s370_s1] sm:$0xff] }
   0x8   :  { %v18_v16 = vld [vmem:[%s369_s0] sm:$0xff]  ;;  %v19_v17 = vld [vmem:[%s369_s0 + $0x8] sm:$0xff] }
   0x9   :  { %v134_v46 = vld [vmem:[%s371_s2] sm:$0x1]  ;;  %s245_s2 = smov 128  }
   0xa   :  { %180 = vmatpush.xpose.msk.msra.mxu0 %vm36_vm0, %v33_v2  ;;  %198 = vmatpush.xpose.msk.msra.mxu1 %vm36_vm0, %v33_v2  ;;  %v215_v51 = vld [vmem:[%s372_s3] ss:$0 sm:$0xff] }
   0xe   :  { %181 = vmatpush.xpose.msk.msra.mxu0 %vm36_vm0, %v32_v3  ;;  %199 = vmatpush.xpose.msk.msra.mxu1 %vm36_vm0, %v32_v3 }
  0x12   :  { %182 = vmatpush.xpose.msk.msra.mxu0 %vm36_vm0, %v31_v4  ;;  %200 = vmatpush.xpose.msk.msra.mxu1 %vm36_vm0, %v31_v4 }
  0x16   :  { %183 = vmatpush.xpose.msk.msra.mxu0 %vm36_vm0, %v30_v5  ;;  %201 = vmatpush.xpose.msk.msra.mxu1 %vm36_vm0, %v30_v5 }
  0x1a   :  { %184 = vmatpush.xpose.msk.msra.mxu0 %vm36_vm0, %v29_v6  ;;  %202 = vmatpush.xpose.msk.msra.mxu1 %vm36_vm0, %v29_v6 }
  0x1e   :  { %185 = vmatpush.xpose.msk.msra.mxu0 %vm36_vm0, %v28_v7  ;;  %203 = vmatpush.xpose.msk.msra.mxu1 %vm36_vm0, %v28_v7 }
  0x22   :  { %186 = vmatpush.xpose.msk.msra.mxu0 %vm36_vm0, %v27_v8  ;;  %204 = vmatpush.xpose.msk.msra.mxu1 %vm36_vm0, %v27_v8 }
  0x26   :  { %187 = vmatpush.xpose.msk.msra.mxu0 %vm36_vm0, %v26_v9  ;;  %205 = vmatpush.xpose.msk.msra.mxu1 %vm36_vm0, %v26_v9 }
  0x2a   :  { %188 = vmatpush.xpose.msk.msra.mxu0 %vm36_vm0, %v25_v10  ;;  %206 = vmatpush.xpose.msk.msra.mxu1 %vm36_vm0, %v25_v10 }
  0x2e   :  { %189 = vmatpush.xpose.msk.msra.mxu0 %vm36_vm0, %v24_v11  ;;  %207 = vmatpush.xpose.msk.msra.mxu1 %vm36_vm0, %v24_v11 }
  0x32   :  { %190 = vmatpush.xpose.msk.msra.mxu0 %vm36_vm0, %v23_v12  ;;  %208 = vmatpush.xpose.msk.msra.mxu1 %vm36_vm0, %v23_v12 }
  0x36   :  { %191 = vmatpush.xpose.msk.msra.mxu0 %vm36_vm0, %v22_v13  ;;  %209 = vmatpush.xpose.msk.msra.mxu1 %vm36_vm0, %v22_v13 }
  0x3a   :  { %192 = vmatpush.xpose.msk.msra.mxu0 %vm36_vm0, %v21_v14  ;;  %210 = vmatpush.xpose.msk.msra.mxu1 %vm36_vm0, %v21_v14 }
  0x3e   :  { %193 = vmatpush.xpose.msk.msra.mxu0 %vm36_vm0, %v20_v15  ;;  %211 = vmatpush.xpose.msk.msra.mxu1 %vm36_vm0, %v20_v15 }
  0x41   :  { %194 = vmatmul.msk.f32.vlgmr.msra.gmra.mxu0 %vm36_vm0, %v18_v16  ;;  %195 = vmatmul.msk.f32.vlgmr.msra.gmra.mxu1 %vm36_vm0, %v19_v17 }
  0xbe   :  { %v108_v18 = vpop.f32.mrf.mxu0  ;;  %v111_v19 = vpop.f32.mrf.mxu1 }
  0xbf   :  { %v114_v20 = vadd.f32 %v111_v19, %v108_v18 }
  0xc1   :  { %v115_v21 = vrot.slane %v114_v20, 4 }
  0xc3   :  { %v116_v22 = vadd.f32 %v115_v21, %v114_v20 }
  0xc5   :  { %v117_v23 = vrot.slane %v116_v22, 2 }
  0xc7   :  { %v118_v24 = vadd.f32 %v117_v23, %v116_v22 }
  0xc9   :  { %v119_v25 = vrot.slane %v118_v24, 1 }
  0xcb   :  { %v120_v26 = vadd.f32 %v119_v25, %v118_v24 }
  0xcd   :  { %v121_v27 = vmul.f32 0.0625, %v120_v26 }
  0xcf   :  { %v122_v28 = vsub.f32 %v108_v18, %v121_v27  ;;  %v123_v29 = vsub.f32 %v111_v19, %v121_v27 }
  0xd1   :  { %v124_v30 = vmul.f32 %v122_v28, %v122_v28  ;;  %v125_v31 = vmul.f32 %v123_v29, %v123_v29 }
  0xd3   :  { %v126_v32 = vadd.f32 %v125_v31, %v124_v30 }
  0xd5   :  { %v127_v33 = vrot.slane %v126_v32, 4 }
  0xd7   :  { %v128_v34 = vadd.f32 %v127_v33, %v126_v32 }
  0xd9   :  { %v129_v35 = vrot.slane %v128_v34, 2 }
  0xdb   :  { %v130_v36 = vadd.f32 %v129_v35, %v128_v34 }
  0xdd   :  { %v131_v37 = vrot.slane %v130_v36, 1 }
  0xdf   :  { %v132_v38 = vadd.f32 %v131_v37, %v130_v36 }
  0xe1   :  { %v133_v39 = vmul.f32 0.0625, %v132_v38 }
  0xe3   :  { %v135_v40 = vadd.f32 1e-05, %v133_v39 }
  0xe5   :  { %216 = vrsqrt.f32 %v135_v40  ;;  %vm142_vm2 = vweird.f32 %v135_v40 }
  0xeb   :  { %v217_v41 = vpop.eup %216 }
  0xec   :  { %v137_v42 = vmul.f32 %v217_v41, %v135_v40  ;;  %vm143_vm1 = vweird.f32 %v217_v41 }
  0xed   :  { %vm144_vm3 = vmor %vm142_vm2, %vm143_vm1 }
  0xee   :  { %v138_v43 = vmul.f32 %v217_v41, %v137_v42 }
  0xf0   :  { %v139_v44 = vmul.f32 0.5, %v138_v43 }
  0xf2   :  { %v140_v45 = vsub.f32 1.5, %v139_v44 }
  0xf4   :  { %v141_v47 = vmul.f32 %v217_v41, %v140_v45 }
  0xf6   :  { %v145_v48 = vsel %vm144_vm3, %v217_v41, %v141_v47 }
  0xf7   :  { %v146_v49 = vmul.f32 %v145_v48, %v134_v46 }
  0xf9   :  { %v148_v50 = vperm.slane %v146_v49, 0 }
  0xfb   :  { %v150_v52 = vmul.f32 %v148_v50, %v122_v28  ;;  %v151_v53 = vmul.f32 %v148_v50, %v123_v29 }
  0xfd   :  { %v156_v54 = vadd.f32 %v215_v51, %v150_v52  ;;  %v157_v55 = vadd.f32 %v215_v51, %v151_v53 }
  0xff   :  { %158 = vst [vmem:[#allocation2] sm:$0xff] %v156_v54 }
 0x100   :  { %159 = vst [vmem:[#allocation2 + $0x8] sm:$0xff] %v157_v55 }
 0x101   :  { %172 = dma.vmem_to_hbm [thread:$0]  %s165_s28, 256, %s167_s5, [#allocation3], %s245_s2, %s245_s2, %s246_s6  }
 0x102   :  { %242 = dma.done.wait [#allocation3], 256  }
 0x103   :  { %243 = vsyncadd [#allocation3], 4294967040 }
 0x104   :  { %177 = vsyncpa [#allocation3], 1 }

</bundles_post_ra>
